<compile_context>
chip_gen: v5e
topology: v5e:2x2
jax: 0.10.0
libtpu: 0.0.40
codegen_flags: <defaults>
</compile_context>

<pallas_src>
import jax
import jax.numpy as jnp
from jax import lax
from jax.experimental import pallas as pl
from jax.experimental.pallas import tpu as pltpu


def _round_up(x, m):
    return ((x + m - 1) // m) * m


def _make_kernel(tile_m, hidden, tot_cat_pad, offsets, use_cat, use_scalar):
    """Fused kernel: combined one-hot lookup + scalar matmul, folded weights."""
    n_cat = len(offsets)

    def kernel(*refs):
        it = iter(refs)
        x_cat_ref = next(it) if use_cat else None      # (tile_m, n_cat) int32
        x_scl_ref = next(it) if use_scalar else None   # (tile_m, S_pad) f32
        w_cat_ref = next(it) if use_cat else None      # (tot_cat_pad, H) f32
        w_scl_ref = next(it) if use_scalar else None   # (S_pad, H) f32
        b_ref = next(it)                               # (1, H) f32  (folded bias)
        o_ref = next(it)                               # (tile_m, H)

        # Seed accumulator with the fused bias.
        acc = jnp.broadcast_to(b_ref[...], (tile_m, hidden)).astype(jnp.float32)

        if use_cat:
            # Build one combined one-hot over the stacked (folded) table:
            # column offset of feature i is offsets[i]; padded columns never hit.
            iota = lax.broadcasted_iota(jnp.int32, (tile_m, tot_cat_pad), 1)
            onehot = None
            for i in range(n_cat):
                g = x_cat_ref[:, i:i + 1] + offsets[i]            # (tile_m, 1)
                m = (iota == g).astype(jnp.float32)               # (tile_m, TOT)
                onehot = m if onehot is None else onehot + m
            acc = acc + jnp.dot(onehot, w_cat_ref[...],
                                preferred_element_type=jnp.float32)

        if use_scalar:
            acc = acc + jnp.dot(x_scl_ref[...].astype(jnp.float32), w_scl_ref[...],
                                preferred_element_type=jnp.float32)

        o_ref[...] = acc.astype(o_ref.dtype)

    return kernel


def feat_encoder(x, params, *, num_categorical_feat, n_cat_use, n_scalar_use,
                 tile_m=256):
    """Fused FeatEncoder.forward.

    x      : (N, num_categorical_feat + n_scalar) float; first columns are the
             categorical indices stored as floats (cast like `.long()`).
    params : dict with 'emb' (list of (C_i, H)), 'w_lin' (S, H), 'b_lin' (1, H),
             'w_map' (total_dim, H), 'b_map' (1, H).
    Returns (N, H) float32.
    """
    hidden = params["w_map"].shape[1]
    n = x.shape[0]
    use_cat = n_cat_use > 0
    use_scalar = n_scalar_use > 0

    w_map, b_map = params["w_map"], params["b_map"]

    # ---- split inputs exactly like the PyTorch forward ---------------------
    if use_cat:
        x_cat = x[:, :n_cat_use].astype(jnp.int32)
    if use_scalar:
        x_scl = x[:, num_categorical_feat:].astype(jnp.float32)

    # ---- one-time parameter folding (batch-size independent) ---------------
    offsets = []
    tot_cat_pad = 0
    if use_cat:
        blocks, off = [], 0
        for i in range(n_cat_use):
            c = params["emb"][i].shape[0]
            wb = w_map[i * hidden:(i + 1) * hidden, :]            # (H, H)
            blocks.append(params["emb"][i] @ wb)                  # (C_i, H)
            offsets.append(off)
            off += c
        w_cat = jnp.concatenate(blocks, axis=0)                   # (sum C_i, H)
        tot_cat_pad = _round_up(off, 8)
        w_cat = jnp.pad(w_cat, ((0, tot_cat_pad - off), (0, 0)))

    bias = b_map
    if use_scalar:
        wb_s = w_map[n_cat_use * hidden:(n_cat_use + 1) * hidden, :]
        w_scl = params["w_lin"] @ wb_s                            # (S, H)
        bias = bias + params["b_lin"] @ wb_s                      # (1, H)
        s = w_scl.shape[0]
        s_pad = _round_up(s, 8)
        w_scl = jnp.pad(w_scl, ((0, s_pad - s), (0, 0)))
        x_scl = jnp.pad(x_scl, ((0, 0), (0, s_pad - s)))

    # ---- row tiling: big tiles amortize per-step overhead; pad & slice back -
    tile = min(_round_up(max(tile_m, 8), 8), _round_up(n, 8))
    n_pad = _round_up(n, tile)
    if n_pad != n:
        if use_cat:
            x_cat = jnp.pad(x_cat, ((0, n_pad - n), (0, 0)))
        if use_scalar:
            x_scl = jnp.pad(x_scl, ((0, n_pad - n), (0, 0)))

    const = lambda a: pl.BlockSpec(a.shape, lambda i: (0, 0))
    inputs, in_specs = [], []
    if use_cat:
        inputs.append(x_cat)
        in_specs.append(pl.BlockSpec((tile, x_cat.shape[1]), lambda i: (i, 0)))
    if use_scalar:
        inputs.append(x_scl)
        in_specs.append(pl.BlockSpec((tile, x_scl.shape[1]), lambda i: (i, 0)))
    if use_cat:
        inputs.append(w_cat)
        in_specs.append(const(w_cat))
    if use_scalar:
        inputs.append(w_scl)
        in_specs.append(const(w_scl))
    inputs.append(bias)
    in_specs.append(const(bias))

    kernel = _make_kernel(tile, hidden, tot_cat_pad, tuple(offsets),
                          use_cat, use_scalar)

    out = pl.pallas_call(
        kernel,
        out_shape=jax.ShapeDtypeStruct((n_pad, hidden), jnp.float32),
        grid_spec=pltpu.PrefetchScalarGridSpec(
            num_scalar_prefetch=0,
            grid=(n_pad // tile,),
            in_specs=in_specs,
            out_specs=pl.BlockSpec((tile, hidden), lambda i: (i, 0)),
        ),
        compiler_params=pltpu.CompilerParams(
            dimension_semantics=("parallel",)),
    )(*inputs)

    return out[:n]


# ---------------------------------------------------------------------------
# Deterministic parameter init + pure-JAX reference (unfolded, for checking)
# ---------------------------------------------------------------------------

def init_params(key, hidden, categorical_feat, scalar_feat):
    n_cat = len(categorical_feat)
    keys = jax.random.split(key, n_cat + 4)
    emb = [jax.random.normal(keys[i], (c, hidden), jnp.float32)
           for i, c in enumerate(categorical_feat)]

    def lin_init(kw, kb, fan_in, fan_out):
        bound = 1.0 / jnp.sqrt(fan_in)
        w = jax.random.uniform(kw, (fan_in, fan_out), jnp.float32, -bound, bound)
        b = jax.random.uniform(kb, (1, fan_out), jnp.float32, -bound, bound)
        return w, b

    w_lin, b_lin = lin_init(keys[n_cat], keys[n_cat + 1], scalar_feat, hidden)
    total_dim = n_cat * hidden + (hidden if scalar_feat > 0 else 0)
    w_map, b_map = lin_init(keys[n_cat + 2], keys[n_cat + 3], total_dim, hidden)
    return dict(emb=emb, w_lin=w_lin, b_lin=b_lin, w_map=w_map, b_map=b_map)


def reference(x, params, *, num_categorical_feat, n_cat_use, n_scalar_use):
    parts = []
    for i in range(n_cat_use):
        idx = x[:, i].astype(jnp.int32)
        parts.append(params["emb"][i][idx])
    if n_scalar_use > 0:
        parts.append(x[:, num_categorical_feat:] @ params["w_lin"] + params["b_lin"])
    cat = jnp.concatenate(parts, axis=-1)
    return cat @ params["w_map"] + params["b_map"]


if __name__ == "__main__":
    hidden = 32
    categorical_feat = [5, 7, 4]   # 3 categorical features
    scalar_feat = 6                # 6 scalar features
    N = 16

    n_cat = len(categorical_feat)
    key = jax.random.PRNGKey(0)
    kp, kx = jax.random.split(key)
    params = init_params(kp, hidden, categorical_feat, scalar_feat)

    # Build x: first n_cat columns are categorical indices (stored as floats,
    # like the PyTorch module expects), remaining columns are scalar features.
    idx_keys = jax.random.split(kx, n_cat + 1)
    idx_cols = [jax.random.randint(idx_keys[i], (N,), 0, categorical_feat[i])
                for i in range(n_cat)]
    x_cat_f = jnp.stack(idx_cols, axis=1).astype(jnp.float32)
    x_scalar = jax.random.normal(idx_keys[n_cat], (N, scalar_feat), jnp.float32)
    x = jnp.concatenate([x_cat_f, x_scalar], axis=1)          # (N, 9)

    out = feat_encoder(x, params,
                       num_categorical_feat=n_cat,
                       n_cat_use=n_cat,
                       n_scalar_use=scalar_feat,
                       tile_m=256)
    out = jax.block_until_ready(out)

    ref = reference(x, params, num_categorical_feat=n_cat,
                    n_cat_use=n_cat, n_scalar_use=scalar_feat)

    assert out.shape == (N, hidden)
    assert jnp.allclose(out, ref, atol=1e-4, rtol=1e-4)

    print("KERNEL_OK")
</pallas_src>

<mosaic_0001>
module attributes {stable_mosaic.version = 11 : i64} {
  func.func @kernel(%arg0: i32, %arg1: memref<16x3xi32, #tpu.memory_space<vmem>>, %arg2: memref<16x8xf32, #tpu.memory_space<vmem>>, %arg3: memref<16x32xf32, #tpu.memory_space<vmem>>, %arg4: memref<8x32xf32, #tpu.memory_space<vmem>>, %arg5: memref<1x32xf32, #tpu.memory_space<vmem>>, %arg6: memref<16x32xf32, #tpu.memory_space<vmem>>) attributes {dimension_semantics = [#tpu.dimension_semantics<parallel>], iteration_bounds = array<i64: 1>, scalar_prefetch = 0 : i64, scratch_operands = 0 : i64, tpu.core_type = #tpu.core_type<tc>, window_params = [{transform_indices = @transform_0, window_bounds = array<i64: 16, 3>}, {transform_indices = @transform_1, window_bounds = array<i64: 16, 8>}, {pipeline_mode = #tpu.pipeline_mode<synchronous>, transform_indices = @transform_2, window_bounds = array<i64: 16, 32>}, {pipeline_mode = #tpu.pipeline_mode<synchronous>, transform_indices = @transform_3, window_bounds = array<i64: 8, 32>}, {pipeline_mode = #tpu.pipeline_mode<synchronous>, transform_indices = @transform_4, window_bounds = array<i64: 1, 32>}, {transform_indices = @transform_5, window_bounds = array<i64: 16, 32>}]} {
    %c0 = arith.constant 0 : index
    %c0_0 = arith.constant 0 : index
    %0 = vector.load %arg5[%c0, %c0_0] : memref<1x32xf32, #tpu.memory_space<vmem>>, vector<1x32xf32>
    %1 = vector.shape_cast %0 : vector<1x32xf32> to vector<1x32xf32>
    %2 = vector.broadcast %1 : vector<1x32xf32> to vector<16x32xf32>
    %3 = tpu.iota {dimensions = array<i32: 1>} : vector<16x16xi32>
    %c0_1 = arith.constant 0 : index
    %c0_2 = arith.constant 0 : index
    %4 = vector.load %arg1[%c0_1, %c0_2] : memref<16x3xi32, #tpu.memory_space<vmem>>, vector<16x1xi32>
    %c0_i32 = arith.constant 0 : i32
    %5 = vector.broadcast %c0_i32 : i32 to vector<16x1xi32>
    %6 = arith.addi %4, %5 : vector<16x1xi32>
    %7 = vector.broadcast %6 : vector<16x1xi32> to vector<16x16xi32>
    %8 = arith.cmpi eq, %3, %7 : vector<16x16xi32>
    %9 = arith.extui %8 : vector<16x16xi1> to vector<16x16xi32>
    %10 = arith.sitofp %9 : vector<16x16xi32> to vector<16x16xf32>
    %c0_3 = arith.constant 0 : index
    %c1 = arith.constant 1 : index
    %11 = vector.load %arg1[%c0_3, %c1] : memref<16x3xi32, #tpu.memory_space<vmem>>, vector<16x1xi32>
    %c5_i32 = arith.constant 5 : i32
    %12 = vector.broadcast %c5_i32 : i32 to vector<16x1xi32>
    %13 = arith.addi %11, %12 : vector<16x1xi32>
    %14 = vector.broadcast %13 : vector<16x1xi32> to vector<16x16xi32>
    %15 = arith.cmpi eq, %3, %14 : vector<16x16xi32>
    %16 = arith.extui %15 : vector<16x16xi1> to vector<16x16xi32>
    %17 = arith.sitofp %16 : vector<16x16xi32> to vector<16x16xf32>
    %18 = arith.addf %10, %17 : vector<16x16xf32>
    %c0_4 = arith.constant 0 : index
    %c2 = arith.constant 2 : index
    %19 = vector.load %arg1[%c0_4, %c2] : memref<16x3xi32, #tpu.memory_space<vmem>>, vector<16x1xi32>
    %c12_i32 = arith.constant 12 : i32
    %20 = vector.broadcast %c12_i32 : i32 to vector<16x1xi32>
    %21 = arith.addi %19, %20 : vector<16x1xi32>
    %22 = vector.broadcast %21 : vector<16x1xi32> to vector<16x16xi32>
    %23 = arith.cmpi eq, %3, %22 : vector<16x16xi32>
    %24 = arith.extui %23 : vector<16x16xi1> to vector<16x16xi32>
    %25 = arith.sitofp %24 : vector<16x16xi32> to vector<16x16xf32>
    %26 = arith.addf %18, %25 : vector<16x16xf32>
    %c0_5 = arith.constant 0 : index
    %c0_6 = arith.constant 0 : index
    %27 = vector.load %arg3[%c0_5, %c0_6] : memref<16x32xf32, #tpu.memory_space<vmem>>, vector<16x32xf32>
    %cst = arith.constant dense<0.000000e+00> : vector<16x32xf32>
    %28 = tpu.matmul %26, %27, %cst {dimension_numbers = #tpu.dot_dimension_numbers<[1], [0], [0], [1], [0, 0, 1, 1], [], []>} : vector<16x16xf32>, vector<16x32xf32>, vector<16x32xf32> -> vector<16x32xf32>
    %29 = arith.addf %2, %28 : vector<16x32xf32>
    %c0_7 = arith.constant 0 : index
    %c0_8 = arith.constant 0 : index
    %30 = vector.load %arg2[%c0_7, %c0_8] : memref<16x8xf32, #tpu.memory_space<vmem>>, vector<16x8xf32>
    %c0_9 = arith.constant 0 : index
    %c0_10 = arith.constant 0 : index
    %31 = vector.load %arg4[%c0_9, %c0_10] : memref<8x32xf32, #tpu.memory_space<vmem>>, vector<8x32xf32>
    %cst_11 = arith.constant dense<0.000000e+00> : vector<16x32xf32>
    %32 = tpu.matmul %30, %31, %cst_11 {dimension_numbers = #tpu.dot_dimension_numbers<[1], [0], [0], [1], [0, 0, 1, 1], [], []>} : vector<16x8xf32>, vector<8x32xf32>, vector<16x32xf32> -> vector<16x32xf32>
    %33 = arith.addf %29, %32 : vector<16x32xf32>
    %c0_12 = arith.constant 0 : index
    %c0_13 = arith.constant 0 : index
    %34 = vector.load %arg6[%c0_12, %c0_13] : memref<16x32xf32, #tpu.memory_space<vmem>>, vector<16x32xf32>
    tpu.vector_store %arg6[%c0_12, %c0_13], %33 {strides = array<i32>} : memref<16x32xf32, #tpu.memory_space<vmem>>, vector<16x32xf32>,
    return
  }
  func.func @transform_0(%arg0: i32) -> (i32, i32) {
    %c0_i32 = arith.constant 0 : i32
    %c0_i32_0 = arith.constant 0 : i32
    return %arg0, %c0_i32 : i32, i32
  }
  func.func @transform_1(%arg0: i32) -> (i32, i32) {
    %c0_i32 = arith.constant 0 : i32
    %c0_i32_0 = arith.constant 0 : i32
    return %arg0, %c0_i32 : i32, i32
  }
  func.func @transform_2(%arg0: i32) -> (i32, i32) {
    %c0_i32 = arith.constant 0 : i32
    %c0_i32_0 = arith.constant 0 : i32
    %c0_i32_1 = arith.constant 0 : i32
    return %c0_i32, %c0_i32_0 : i32, i32
  }
  func.func @transform_3(%arg0: i32) -> (i32, i32) {
    %c0_i32 = arith.constant 0 : i32
    %c0_i32_0 = arith.constant 0 : i32
    %c0_i32_1 = arith.constant 0 : i32
    return %c0_i32, %c0_i32_0 : i32, i32
  }
  func.func @transform_4(%arg0: i32) -> (i32, i32) {
    %c0_i32 = arith.constant 0 : i32
    %c0_i32_0 = arith.constant 0 : i32
    %c0_i32_1 = arith.constant 0 : i32
    return %c0_i32, %c0_i32_0 : i32, i32
  }
  func.func @transform_5(%arg0: i32) -> (i32, i32) {
    %c0_i32 = arith.constant 0 : i32
    %c0_i32_0 = arith.constant 0 : i32
    return %arg0, %c0_i32 : i32, i32
  }
}

</mosaic_0001>

<bundles_post_ra>
// kernel: tpu_custom_call.1
= control target key start
LH: loop header
LB: loop body
LE: loop exit
PB: predicated region body
PF: predicated region fallthrough
CT: control target
= control target key end

     0   :  { %v217_v2 = vmov 0   ;;  %v218_v3 = vmov 2   ;;  %v219_v6 = vmov 1   ;;  %s281_s0 = inlined_call_operand.vmem [shape: s32[16,3], index: 0, kind: input, shape index: {}]   ;;  %s282_s1 = inlined_call_operand.vmem [shape: f32[16,8], index: 1, kind: input, shape index: {}]   ;;  %s283_s2 = inlined_call_operand.vmem [shape: f32[16,32], index: 2, kind: input, shape index: {}]   ;;  %s284_s3 = inlined_call_operand.vmem [shape: f32[8,32], index: 3, kind: input, shape index: {}]   ;;  %s285_s4 = inlined_call_operand.vmem [shape: f32[1,32], index: 4, kind: input, shape index: {}]   ;;  %s286_s5 = inlined_call_operand.hbm [shape: f32[16,32], index: 5, kind: output, shape index: {}]  }
   0x1   :  { %v28_v0 = vld [vmem:[%s281_s0 + $0x8] sm:$0xff]  ;;  %v27_v1 = vld [vmem:[%s281_s0] sm:$0xff]  ;;  %183 = vset.pattern.permute.xlu0 %v217_v2  ;;  %185 = vset.pattern.permute.xlu1 %v218_v3 }
   0x2   :  { %v58_v4 = vadd.s32 12, %v28_v0  ;;  %v41_v5 = vadd.s32 5, %v27_v1  ;;  %33 = vperm.xlu0 %183, %v28_v0   ;;  %187 = vset.pattern.permute.xlu2 %v219_v6 }
   0x3   :  { %10 = vsyncpa [#allocation3], 0  ;;  %v42_v7 = vadd.s32 5, %v28_v0  ;;  %v57_v8 = vadd.s32 12, %v27_v1  ;;  %v74_v9 = vld [vmem:[%s283_s2 + $0x8] sm:$0xff]  ;;  %v73_v10 = vld [vmem:[%s283_s2] sm:$0xff]  ;;  %v25_v16 = vlaneseq }
   0x4   :  { %63 = vperm.xlu1 %185, %v58_v4   ;;  %44 = vperm.xlu2 %187, %v41_v5   ;;  %v109_v11 = vld [vmem:[%s284_s3] sm:$0xff]  ;;  %v108_v12 = vld [vmem:[%s282_s1 + $0x8] sm:$0xff]  ;;  %vm110_vm0 = vcmask 64512   ;;  %v220_v22 = vmov 0.0   ;;  %vm75_vm7 = vcmask 130048   ;;  %vm142_vm8 = vcmask 261120  }
   0x5   :  { %173 = vmatpush.msra.mxu2 %v74_v9  ;;  %96 = vmatpush.msra.mxu0 %v74_v9  ;;  %v107_v13 = vld [vmem:[%s282_s1] sm:$0xff]  ;;  %v26_v18 = vand.u32 127, %v25_v16  ;;  %s221_s3 = smov [#allocation2]   ;;  %s151_s9 = sshll.u32 %s286_s5, 4  ;;  %s152_s9 = int_to_ptr.hbm [resolvable:$true] %s151_s9 }
   0x6   :  { %175 = vmatpush.msra.mxu3 %v109_v11  ;;  %132 = vmatpush.msra.mxu1 %v109_v11  ;;  %v190_v33 = vld [vmem:[%s285_s4] ss:$0 sm:$0xff]  ;;  %s149_s6 = sshll.u32 %s221_s3, 4  ;;  %s222_s4 = smov 128   ;;  %s150_s6 = int_to_ptr.vmem [resolvable:$true] %s149_s6 }
   0x7   :  { %174 = vmatpush.msra.mxu2 %v73_v10  ;;  %97 = vmatpush.msra.mxu0 %v73_v10  ;;  %s223_s10 = smov 8  }
   0x8   :  { %172 = vmatmul.msk.f32.vlgmr.msra.gmra.mxu3 %vm110_vm0, %v108_v12  ;;  %171 = vmatmul.msk.f32.vlgmr.msra.gmra.mxu1 %vm110_vm0, %v107_v13 }
   0xa   :  { %184 = vset.pattern.permute.xlu0 %v219_v6 }
   0xb   :  { %47 = vperm.xlu0 %184, %v42_v7  }
   0xc   :  { %186 = vset.pattern.permute.xlu1 %v217_v2  ;;  %188 = vset.pattern.permute.xlu2 %v218_v3 }
   0xd   :  { %30 = vperm.xlu1 %186, %v27_v1   ;;  %60 = vperm.xlu2 %188, %v57_v8  }
  0x13   :  { %189 = vset.pattern.permute.xlu0 %v218_v3 }
  0x5e   :  { %v45_v14 = vpop.permute.xlu2 %44 }
  0x5f   :  { %vm49_vm2 = vcmp.eq.s32.totalorder %v26_v18, %v45_v14 }
  0x60   :  { %v165_v25 = vsel %vm49_vm2, 1.0, %v220_v22 }
  0x67   :  { %v61_v19 = vpop.permute.xlu2 %60 }
  0x68   :  { %vm65_vm3 = vcmp.eq.s32.totalorder %v26_v18, %v61_v19 }
  0x69   :  { %v167_v28 = vsel %vm65_vm3, 1.0, %v220_v22 }
  0x74   :  { %v34_v15 = vpop.permute.xlu0 %33 }
  0x75   :  { %vm36_vm1 = vcmp.eq.s32.totalorder %v26_v18, %v34_v15 }
  0x76   :  { %v64_v17 = vpop.permute.xlu1 %63  ;;  %v164_v23 = vsel %vm36_vm1, 1.0, %v220_v22 }
  0x77   :  { %vm66_vm4 = vcmp.eq.s32.totalorder %v26_v18, %v64_v17 }
  0x78   :  { %v168_v29 = vsel %vm66_vm4, 1.0, %v220_v22 }
  0x7d   :  { %v48_v20 = vpop.permute.xlu0 %47 }
  0x7e   :  { %vm50_vm5 = vcmp.eq.s32.totalorder %v26_v18, %v48_v20 }
  0x7f   :  { %v31_v21 = vpop.permute.xlu1 %30  ;;  %v166_v24 = vsel %vm50_vm5, 1.0, %v220_v22 }
  0x80   :  { %vm35_vm6 = vcmp.eq.s32.totalorder %v26_v18, %v31_v21  ;;  %v56_v26 = vadd.f32 %v166_v24, %v164_v23 }
  0x81   :  { %v163_v27 = vsel %vm35_vm6, 1.0, %v220_v22 }
  0x82   :  { %v55_v30 = vadd.f32 %v165_v25, %v163_v27  ;;  %v72_v31 = vadd.f32 %v168_v29, %v56_v26 }
  0x84   :  { %v71_v32 = vadd.f32 %v167_v28, %v55_v30  ;;  %170 = vmatmul.msk.f32.vlgmr.msra.gmra.mxu2 %vm75_vm7, %v72_v31 }
  0x85   :  { %v134_v35 = vpop.f32.mrf.mxu1 }
  0x86   :  { %169 = vmatmul.msk.f32.vlgmr.msra.gmra.mxu0 %vm75_vm7, %v71_v32 }
  0x8b   :  { %v137_v39 = vpop.f32.mrf.mxu3 }
 0x103   :  { %v99_v34 = vpop.f32.mrf.mxu0 }
 0x104   :  { %v105_v36 = vadd.f32 %v190_v33, %v99_v34 }
 0x106   :  { %v140_v37 = vadd.f32 %v134_v35, %v105_v36 }
 0x107   :  { %v102_v38 = vpop.f32.mrf.mxu2 }
 0x108   :  { %143 = vst.msk [vmem:[#allocation2] sm:$0xff] %vm142_vm8, %v140_v37  ;;  %v106_v40 = vadd.f32 %v190_v33, %v102_v38 }
 0x10a   :  { %v141_v41 = vadd.f32 %v137_v39, %v106_v40 }
 0x10c   :  { %144 = vst.msk [vmem:[#allocation2 + $0x8] sm:$0xff] %vm142_vm8, %v141_v41 }
 0x10d   :  { %157 = dma.vmem_to_hbm [thread:$0]  %s150_s6, 256, %s152_s9, [#allocation3], %s222_s4, %s222_s4, %s223_s10  }
 0x10e   :  { %215 = dma.done.wait [#allocation3], 256  }
 0x10f   :  { %216 = vsyncadd [#allocation3], 4294967040 }
 0x110   :  { %162 = vsyncpa [#allocation3], 1 }

</bundles_post_ra>
